<compile_context>
chip_gen: v7x
topology: tpu7x:2x2x1
jax: 0.10.0
libtpu: 0.0.40
codegen_flags: <defaults>
</compile_context>

<pallas_src>
import functools

import jax
import jax.numpy as jnp
from jax.experimental import pallas as pl
from jax.experimental.pallas import tpu as pltpu


_MAX_TILE_ROWS = 8192   # review: allow large row tiles; VMEM budget is the real cap


def _detect_num_tensorcores():
    """Best-effort TensorCores-per-chip query (v7x: 2, v5e/v6e: 1)."""
    try:
        info = pltpu.get_tpu_info()
    except Exception:
        return 1
    for name in ("num_tensorcores", "tensorcore_count", "num_cores",
                 "core_count", "cores_per_chip", "num_cores_per_chip"):
        val = getattr(info, name, None)
        try:
            val = int(val)
        except (TypeError, ValueError):
            continue
        if 1 <= val <= 4:
            return val
    return 1


def _vmem_limit_bytes():
    """Generation-aware VMEM limit: ~48 MiB on 64 MiB v7x, ~96 MiB on v5e/v6e."""
    cap = 0
    try:
        cap = int(pltpu.get_tpu_info().vmem_capacity_bytes)
    except Exception:
        cap = 0
    if cap <= 0:
        cap = 64 << 20                      # conservative fallback (v7x-sized)
    return int(min(cap - cap // 4, 96 << 20))


def _pick_tile_rows(num_rows, row_width, itemsize, vmem_limit):
    """Largest row tile whose double-buffered inputs + f32 temporaries fit."""
    # 3 inputs x 2 pipeline buffers in storage dtype, plus ~5 f32-sized
    # temporaries per row (a/p/n upcasts and the two squared differences).
    per_row = row_width * (6 * itemsize + 5 * 4)
    budget = max(vmem_limit - (2 << 20), 1 << 20)
    tb = budget // max(per_row, 1)
    tb = max(32, min(_MAX_TILE_ROWS, (tb // 32) * 32))
    if num_rows <= tb:
        return num_rows                     # full-extent block: always legal
    return tb


def _clamped_index_map(c, i, *, tiles_per_core, num_tiles):
    # Tile `c * tiles_per_core + i`; clamp so a core with fewer real tiles just
    # re-reads the last tile (its contribution is skipped/masked in the kernel).
    tile = jnp.minimum(c * tiles_per_core + i, num_tiles - 1)
    return (tile, 0)


def _triplet_loss_kernel(margin_ref, a_ref, p_ref, n_ref, out_ref, *,
                         seg_width, num_segments, rows_valid, tile_rows,
                         tiles_per_core, num_tiles, guard):
    c = pl.program_id(0)     # TensorCore split axis
    i = pl.program_id(1)     # batch-tile index within this core's share

    @pl.when(i == 0)
    def _():
        out_ref[...] = jnp.zeros_like(out_ref)

    def compute():
        # Upcast once in-kernel (bf16 streams as bf16 from HBM; v5e has no bf16 VPU).
        a = a_ref[...].astype(jnp.float32)
        p = p_ref[...].astype(jnp.float32)
        n = n_ref[...].astype(jnp.float32)
        dp = a - p
        dn = a - n
        e = dp * dp - dn * dn                       # (TB, row_width) elementwise

        # Mask packed rows beyond the real row count (partial edge tile).
        tile = c * tiles_per_core + i
        row = tile * tile_rows + jax.lax.broadcasted_iota(
            jnp.int32, (tile_rows, 1), 0)
        valid = row < rows_valid                    # (TB, 1)

        margin = margin_ref[0]
        total = jnp.float32(0.0)
        # Static unroll over the g packed segments (g == 1 for the plain layout).
        for j in range(num_segments):
            s_j = jnp.sum(e[:, j * seg_width:(j + 1) * seg_width],
                          axis=1, keepdims=True)    # (TB, 1) lane reduce
            loss_j = jnp.maximum(s_j + margin, 0.0)
            # Select (not multiply): padded edge rows may hold garbage/NaN.
            loss_j = jnp.where(valid, loss_j, 0.0)
            total = total + jnp.sum(loss_j)

        # Resident per-core scalar accumulator (same output block for every i).
        out_ref[...] = out_ref[...] + total

    if guard:
        pl.when(c * tiles_per_core + i < num_tiles)(compute)
    else:
        compute()


def triplet_loss(anchor, positive, negative, margin, size_average=True, *,
                 tile_rows=None, num_core_splits=None, core_parallel=None):
    """anchor/positive/negative: (B, D) arrays (any float dtype). Returns scalar f32."""
    B, D = anchor.shape
    assert positive.shape == (B, D) and negative.shape == (B, D)
    itemsize = jnp.dtype(anchor.dtype).itemsize

    # Lane-dense packing for small feature dims: fold g = 128 // D consecutive
    # rows into one 128-wide packed row so HBM tiles and vregs are dense.
    g = 1
    if 16 <= D < 128 and 128 % D == 0 and B % (128 // D) == 0:
        g = 128 // D
    if g > 1:
        a2 = anchor.reshape(B // g, g * D)
        p2 = positive.reshape(B // g, g * D)
        n2 = negative.reshape(B // g, g * D)
    else:
        a2, p2, n2 = anchor, positive, negative
    num_rows, row_width = a2.shape

    detected_cores = _detect_num_tensorcores()
    if num_core_splits is None:
        num_core_splits = detected_cores
    num_core_splits = max(1, int(num_core_splits))
    if core_parallel is None:
        core_parallel = (num_core_splits > 1 and num_core_splits == detected_cores)

    vmem_limit = _vmem_limit_bytes()
    if tile_rows is None:
        tb = _pick_tile_rows(num_rows, row_width, itemsize, vmem_limit)
    else:
        sub = max(8, 32 // itemsize)       # sublane multiple: f32 8, bf16 16, int8 32
        tb = max(sub, ((int(tile_rows) + sub - 1) // sub) * sub)
        if tb >= num_rows:
            tb = num_rows

    num_tiles = pl.cdiv(num_rows, tb)
    tiles_per_core = pl.cdiv(num_tiles, num_core_splits)
    guard = num_core_splits * tiles_per_core > num_tiles

    kernel = functools.partial(
        _triplet_loss_kernel,
        seg_width=D, num_segments=g, rows_valid=num_rows, tile_rows=tb,
        tiles_per_core=tiles_per_core, num_tiles=num_tiles, guard=guard)

    if num_core_splits == 1:
        emb_index = lambda c, i: (i, 0)
    else:
        emb_index = functools.partial(
            _clamped_index_map, tiles_per_core=tiles_per_core, num_tiles=num_tiles)
    emb_spec = pl.BlockSpec((tb, row_width), emb_index)

    axis0_sem = (pltpu.CORE_PARALLEL if (num_core_splits > 1 and core_parallel)
                 else pltpu.ARBITRARY)

    margin_arr = jnp.reshape(jnp.asarray(margin, dtype=jnp.float32), (1,))

    partials = pl.pallas_call(
        kernel,
        out_shape=jax.ShapeDtypeStruct((num_core_splits, 1, 1), jnp.float32),
        grid=(num_core_splits, tiles_per_core),
        in_specs=[
            pl.BlockSpec(memory_space=pltpu.MemorySpace.SMEM),   # margin scalar
            emb_spec, emb_spec, emb_spec,
        ],
        out_specs=pl.BlockSpec((None, 1, 1), lambda c, i: (c, 0, 0)),
        compiler_params=pltpu.CompilerParams(
            dimension_semantics=(axis0_sem, pltpu.ARBITRARY),
            vmem_limit_bytes=int(vmem_limit)),
        cost_estimate=pl.CostEstimate(
            flops=8 * B * D,
            transcendentals=0,
            bytes_accessed=3 * B * D * itemsize + 4 * num_core_splits),
    )(margin_arr, a2, p2, n2)

    total = jnp.sum(partials)                 # combine per-core partial sums
    if size_average:
        total = total / jnp.float32(B)        # mean finalized once, in the wrapper
    return total


def _reference(anchor, positive, negative, margin, size_average=True):
    a = anchor.astype(jnp.float32)
    p = positive.astype(jnp.float32)
    n = negative.astype(jnp.float32)
    d_pos = jnp.sum((a - p) ** 2, axis=1)
    d_neg = jnp.sum((a - n) ** 2, axis=1)
    losses = jnp.maximum(d_pos - d_neg + margin, 0.0)
    return jnp.mean(losses) if size_average else jnp.sum(losses)


if __name__ == "__main__":
    margin = 1.0

    # Test 1: small f32, lane-dense packed path (D=32 -> 4 rows per packed row).
    k1, k2, k3 = jax.random.split(jax.random.PRNGKey(0), 3)
    B, D = 8, 32
    anchor = jax.random.normal(k1, (B, D), dtype=jnp.float32)
    positive = anchor + 0.1 * jax.random.normal(k2, (B, D), dtype=jnp.float32)
    negative = jax.random.normal(k3, (B, D), dtype=jnp.float32)
    out = jax.block_until_ready(triplet_loss(anchor, positive, negative, margin))
    ref = _reference(anchor, positive, negative, margin)
    assert jnp.allclose(out, ref, rtol=1e-5, atol=1e-5), (out, ref)

    # Test 2: bf16 streaming, multi-tile accumulation + edge-row masking, sum.
    k4, k5, k6 = jax.random.split(jax.random.PRNGKey(1), 3)
    B2, D2 = 80, 32
    a2 = jax.random.normal(k4, (B2, D2), dtype=jnp.bfloat16)
    p2 = jax.random.normal(k5, (B2, D2), dtype=jnp.bfloat16)
    n2 = jax.random.normal(k6, (B2, D2), dtype=jnp.bfloat16)
    out2 = jax.block_until_ready(
        triplet_loss(a2, p2, n2, margin, size_average=False, tile_rows=16))
    ref2 = _reference(a2, p2, n2, margin, size_average=False)
    assert jnp.allclose(out2, ref2, rtol=1e-4, atol=1e-3), (out2, ref2)

    # Test 3: forced 2-way core split with "arbitrary" semantics (safe on 1-TC
    # chips) to exercise the clamped-duplicate guard + per-core partial sums.
    k7, k8, k9 = jax.random.split(jax.random.PRNGKey(2), 3)
    B3, D3 = 48, 64
    a3 = jax.random.normal(k7, (B3, D3), dtype=jnp.float32)
    p3 = jax.random.normal(k8, (B3, D3), dtype=jnp.float32)
    n3 = jax.random.normal(k9, (B3, D3), dtype=jnp.float32)
    out3 = jax.block_until_ready(
        triplet_loss(a3, p3, n3, 0.5, size_average=True, tile_rows=8,
                     num_core_splits=2, core_parallel=False))
    ref3 = _reference(a3, p3, n3, 0.5, size_average=True)
    assert jnp.allclose(out3, ref3, rtol=1e-5, atol=1e-5), (out3, ref3)

    # Test 4: non-packable feature dim (fallback lane-sparse path, D=100).
    ka, kb, kc = jax.random.split(jax.random.PRNGKey(3), 3)
    B4, D4 = 24, 100
    a4 = jax.random.normal(ka, (B4, D4), dtype=jnp.float32)
    p4 = jax.random.normal(kb, (B4, D4), dtype=jnp.float32)
    n4 = jax.random.normal(kc, (B4, D4), dtype=jnp.float32)
    out4 = jax.block_until_ready(triplet_loss(a4, p4, n4, margin))
    ref4 = _reference(a4, p4, n4, margin)
    assert jnp.allclose(out4, ref4, rtol=1e-5, atol=1e-5), (out4, ref4)

    print("KERNEL_OK")
</pallas_src>

<mosaic_0001>
module attributes {stable_mosaic.version = 11 : i64} {
  func.func @_triplet_loss_kernel(%arg0: i32, %arg1: i32, %arg2: memref<1xf32, #tpu.memory_space<smem>>, %arg3: memref<2x128xf32, #tpu.memory_space<vmem>>, %arg4: memref<2x128xf32, #tpu.memory_space<vmem>>, %arg5: memref<2x128xf32, #tpu.memory_space<vmem>>, %arg6: memref<1x1x1xf32, #tpu.memory_space<vmem>>) attributes {dimension_semantics = [#tpu.dimension_semantics<arbitrary>, #tpu.dimension_semantics<arbitrary>], iteration_bounds = array<i64: 1, 1>, scalar_prefetch = 0 : i64, scratch_operands = 0 : i64, tpu.core_type = #tpu.core_type<tc>, window_params = [{transform_indices = @transform_0, window_bounds = array<i64: 1>}, {transform_indices = @transform_1, window_bounds = array<i64: 2, 128>}, {transform_indices = @transform_2, window_bounds = array<i64: 2, 128>}, {transform_indices = @transform_3, window_bounds = array<i64: 2, 128>}, {transform_indices = @transform_4, window_bounds = array<i64: 1, 1, 1>}]} {
    %c0_i32 = arith.constant 0 : i32
    %0 = arith.cmpi eq, %arg1, %c0_i32 : i32
    %1 = arith.extui %0 : i1 to i32
    %c0_i32_0 = arith.constant 0 : i32
    %2 = arith.cmpi ne, %1, %c0_i32_0 : i32
    scf.if %2 {
      %cst_30 = arith.constant 0.000000e+00 : f32
      %83 = vector.broadcast %cst_30 : f32 to vector<1x1xf32>
      %c0_31 = arith.constant 0 : index
      %c0_32 = arith.constant 0 : index
      %c0_33 = arith.constant 0 : index
      %84 = vector.load %arg6[%c0_31, %c0_32, %c0_33] : memref<1x1x1xf32, #tpu.memory_space<vmem>>, vector<1x1x1xf32>
      %85 = vector.shape_cast %84 : vector<1x1x1xf32> to vector<1x1xf32>
      %86 = vector.shape_cast %83 : vector<1x1xf32> to vector<1x1x1xf32>
      tpu.vector_store %arg6[%c0_31, %c0_32, %c0_33], %86 {strides = array<i32>} : memref<1x1x1xf32, #tpu.memory_space<vmem>>, vector<1x1x1xf32>,
    } else {
    }
    %c0 = arith.constant 0 : index
    %c0_1 = arith.constant 0 : index
    %3 = vector.load %arg3[%c0, %c0_1] : memref<2x128xf32, #tpu.memory_space<vmem>>, vector<2x128xf32>
    %c0_2 = arith.constant 0 : index
    %c0_3 = arith.constant 0 : index
    %4 = vector.load %arg4[%c0_2, %c0_3] : memref<2x128xf32, #tpu.memory_space<vmem>>, vector<2x128xf32>
    %c0_4 = arith.constant 0 : index
    %c0_5 = arith.constant 0 : index
    %5 = vector.load %arg5[%c0_4, %c0_5] : memref<2x128xf32, #tpu.memory_space<vmem>>, vector<2x128xf32>
    %6 = arith.subf %3, %4 : vector<2x128xf32>
    %7 = arith.subf %3, %5 : vector<2x128xf32>
    %8 = arith.mulf %6, %6 : vector<2x128xf32>
    %9 = arith.mulf %7, %7 : vector<2x128xf32>
    %10 = arith.subf %8, %9 : vector<2x128xf32>
    %c1_i32 = arith.constant 1 : i32
    %11 = arith.muli %arg0, %c1_i32 : i32
    %12 = arith.addi %11, %arg1 : i32
    %c2_i32 = arith.constant 2 : i32
    %13 = arith.muli %12, %c2_i32 : i32
    %14 = tpu.iota {dimensions = array<i32: 0>} : vector<2x1xi32>
    %15 = vector.broadcast %13 : i32 to vector<2x1xi32>
    %16 = arith.addi %15, %14 : vector<2x1xi32>
    %c2_i32_6 = arith.constant 2 : i32
    %17 = vector.broadcast %c2_i32_6 : i32 to vector<2x1xi32>
    %18 = arith.cmpi slt, %16, %17 : vector<2x1xi32>
    %c0_7 = arith.constant 0 : index
    %19 = memref.load %arg2[%c0_7] : memref<1xf32, #tpu.memory_space<smem>>
    %20 = vector.extract_strided_slice %10 {offsets = [0, 0], sizes = [2, 32], strides = [1, 1]} : vector<2x128xf32> to vector<2x32xf32>
    %cst = arith.constant dense<0.000000e+00> : vector<2xf32>
    %21 = vector.multi_reduction <add>, %20, %cst [1] : vector<2x32xf32> to vector<2xf32>
    %22 = vector.shape_cast %21 : vector<2xf32> to vector<2x1xf32>
    %23 = vector.broadcast %19 : f32 to vector<2x1xf32>
    %24 = arith.addf %22, %23 : vector<2x1xf32>
    %cst_8 = arith.constant 0.000000e+00 : f32
    %25 = vector.broadcast %cst_8 : f32 to vector<2x1xf32>
    %26 = arith.maximumf %24, %25 : vector<2x1xf32>
    %cst_9 = arith.constant 0.000000e+00 : f32
    %27 = vector.broadcast %cst_9 : f32 to vector<2x1xf32>
    %28 = arith.select %18, %26, %27 : vector<2x1xi1>, vector<2x1xf32>
    %29 = vector.shape_cast %28 : vector<2x1xf32> to vector<1x2x1xf32>
    %cst_10 = arith.constant dense<0.000000e+00> : vector<1xf32>
    %30 = vector.multi_reduction <add>, %29, %cst_10 [1, 2] : vector<1x2x1xf32> to vector<1xf32>
    %31 = vector.shape_cast %30 : vector<1xf32> to vector<1x1x1xf32>
    %32 = vector.extract %31[0, 0, 0] : f32 from vector<1x1x1xf32>
    %cst_11 = arith.constant 0.000000e+00 : f32
    %33 = arith.addf %cst_11, %32 : f32
    %34 = vector.extract_strided_slice %10 {offsets = [0, 32], sizes = [2, 32], strides = [1, 1]} : vector<2x128xf32> to vector<2x32xf32>
    %cst_12 = arith.constant dense<0.000000e+00> : vector<2xf32>
    %35 = vector.multi_reduction <add>, %34, %cst_12 [1] : vector<2x32xf32> to vector<2xf32>
    %36 = vector.shape_cast %35 : vector<2xf32> to vector<2x1xf32>
    %37 = vector.broadcast %19 : f32 to vector<2x1xf32>
    %38 = arith.addf %36, %37 : vector<2x1xf32>
    %cst_13 = arith.constant 0.000000e+00 : f32
    %39 = vector.broadcast %cst_13 : f32 to vector<2x1xf32>
    %40 = arith.maximumf %38, %39 : vector<2x1xf32>
    %cst_14 = arith.constant 0.000000e+00 : f32
    %41 = vector.broadcast %cst_14 : f32 to vector<2x1xf32>
    %42 = arith.select %18, %40, %41 : vector<2x1xi1>, vector<2x1xf32>
    %43 = vector.shape_cast %42 : vector<2x1xf32> to vector<1x2x1xf32>
    %cst_15 = arith.constant dense<0.000000e+00> : vector<1xf32>
    %44 = vector.multi_reduction <add>, %43, %cst_15 [1, 2] : vector<1x2x1xf32> to vector<1xf32>
    %45 = vector.shape_cast %44 : vector<1xf32> to vector<1x1x1xf32>
    %46 = vector.extract %45[0, 0, 0] : f32 from vector<1x1x1xf32>
    %47 = arith.addf %33, %46 : f32
    %48 = vector.extract_strided_slice %10 {offsets = [0, 64], sizes = [2, 32], strides = [1, 1]} : vector<2x128xf32> to vector<2x32xf32>
    %cst_16 = arith.constant dense<0.000000e+00> : vector<2xf32>
    %49 = vector.multi_reduction <add>, %48, %cst_16 [1] : vector<2x32xf32> to vector<2xf32>
    %50 = vector.shape_cast %49 : vector<2xf32> to vector<2x1xf32>
    %51 = vector.broadcast %19 : f32 to vector<2x1xf32>
    %52 = arith.addf %50, %51 : vector<2x1xf32>
    %cst_17 = arith.constant 0.000000e+00 : f32
    %53 = vector.broadcast %cst_17 : f32 to vector<2x1xf32>
    %54 = arith.maximumf %52, %53 : vector<2x1xf32>
    %cst_18 = arith.constant 0.000000e+00 : f32
    %55 = vector.broadcast %cst_18 : f32 to vector<2x1xf32>
    %56 = arith.select %18, %54, %55 : vector<2x1xi1>, vector<2x1xf32>
    %57 = vector.shape_cast %56 : vector<2x1xf32> to vector<1x2x1xf32>
    %cst_19 = arith.constant dense<0.000000e+00> : vector<1xf32>
    %58 = vector.multi_reduction <add>, %57, %cst_19 [1, 2] : vector<1x2x1xf32> to vector<1xf32>
    %59 = vector.shape_cast %58 : vector<1xf32> to vector<1x1x1xf32>
    %60 = vector.extract %59[0, 0, 0] : f32 from vector<1x1x1xf32>
    %61 = arith.addf %47, %60 : f32
    %62 = vector.extract_strided_slice %10 {offsets = [0, 96], sizes = [2, 32], strides = [1, 1]} : vector<2x128xf32> to vector<2x32xf32>
    %cst_20 = arith.constant dense<0.000000e+00> : vector<2xf32>
    %63 = vector.multi_reduction <add>, %62, %cst_20 [1] : vector<2x32xf32> to vector<2xf32>
    %64 = vector.shape_cast %63 : vector<2xf32> to vector<2x1xf32>
    %65 = vector.broadcast %19 : f32 to vector<2x1xf32>
    %66 = arith.addf %64, %65 : vector<2x1xf32>
    %cst_21 = arith.constant 0.000000e+00 : f32
    %67 = vector.broadcast %cst_21 : f32 to vector<2x1xf32>
    %68 = arith.maximumf %66, %67 : vector<2x1xf32>
    %cst_22 = arith.constant 0.000000e+00 : f32
    %69 = vector.broadcast %cst_22 : f32 to vector<2x1xf32>
    %70 = arith.select %18, %68, %69 : vector<2x1xi1>, vector<2x1xf32>
    %71 = vector.shape_cast %70 : vector<2x1xf32> to vector<1x2x1xf32>
    %cst_23 = arith.constant dense<0.000000e+00> : vector<1xf32>
    %72 = vector.multi_reduction <add>, %71, %cst_23 [1, 2] : vector<1x2x1xf32> to vector<1xf32>
    %73 = vector.shape_cast %72 : vector<1xf32> to vector<1x1x1xf32>
    %74 = vector.extract %73[0, 0, 0] : f32 from vector<1x1x1xf32>
    %75 = arith.addf %61, %74 : f32
    %c0_24 = arith.constant 0 : index
    %c0_25 = arith.constant 0 : index
    %c0_26 = arith.constant 0 : index
    %76 = vector.load %arg6[%c0_24, %c0_25, %c0_26] : memref<1x1x1xf32, #tpu.memory_space<vmem>>, vector<1x1x1xf32>
    %77 = vector.shape_cast %76 : vector<1x1x1xf32> to vector<1x1xf32>
    %78 = vector.broadcast %75 : f32 to vector<1x1xf32>
    %79 = arith.addf %77, %78 : vector<1x1xf32>
    %c0_27 = arith.constant 0 : index
    %c0_28 = arith.constant 0 : index
    %c0_29 = arith.constant 0 : index
    %80 = vector.load %arg6[%c0_27, %c0_28, %c0_29] : memref<1x1x1xf32, #tpu.memory_space<vmem>>, vector<1x1x1xf32>
    %81 = vector.shape_cast %80 : vector<1x1x1xf32> to vector<1x1xf32>
    %82 = vector.shape_cast %79 : vector<1x1xf32> to vector<1x1x1xf32>
    tpu.vector_store %arg6[%c0_27, %c0_28, %c0_29], %82 {strides = array<i32>} : memref<1x1x1xf32, #tpu.memory_space<vmem>>, vector<1x1x1xf32>,
    return
  }
  func.func @transform_0(%arg0: i32, %arg1: i32) -> i32 {
    %c0_i32 = arith.constant 0 : i32
    %c0_i32_0 = arith.constant 0 : i32
    return %c0_i32 : i32
  }
  func.func @transform_1(%arg0: i32, %arg1: i32) -> (i32, i32) {
    %c0_i32 = arith.constant 0 : i32
    %c0_i32_0 = arith.constant 0 : i32
    return %arg1, %c0_i32 : i32, i32
  }
  func.func @transform_2(%arg0: i32, %arg1: i32) -> (i32, i32) {
    %c0_i32 = arith.constant 0 : i32
    %c0_i32_0 = arith.constant 0 : i32
    return %arg1, %c0_i32 : i32, i32
  }
  func.func @transform_3(%arg0: i32, %arg1: i32) -> (i32, i32) {
    %c0_i32 = arith.constant 0 : i32
    %c0_i32_0 = arith.constant 0 : i32
    return %arg1, %c0_i32 : i32, i32
  }
  func.func @transform_4(%arg0: i32, %arg1: i32) -> (i32, i32, i32) {
    %c0_i32 = arith.constant 0 : i32
    %c0_i32_0 = arith.constant 0 : i32
    %c0_i32_1 = arith.constant 0 : i32
    return %arg0, %c0_i32, %c0_i32_0 : i32, i32, i32
  }
}

</mosaic_0001>

<bundles_post_ra>
// kernel: tpu_custom_call.1
= control target key start
LH: loop header
LB: loop body
LE: loop exit
PB: predicated region body
PF: predicated region fallthrough
CT: control target
= control target key end

     0   :  { %s242_s0 = inlined_call_operand.<no memory space> [shape: f32[1], index: 0, kind: input, shape index: {}]   ;;  %s243_s1 = inlined_call_operand.vmem [shape: f32[2,128], index: 1, kind: input, shape index: {}]   ;;  %s244_s2 = inlined_call_operand.vmem [shape: f32[2,128], index: 2, kind: input, shape index: {}]   ;;  %s245_s3 = inlined_call_operand.vmem [shape: f32[2,128], index: 3, kind: input, shape index: {}]   ;;  %s246_s4 = inlined_call_operand.hbm [shape: f32[1,1,1], index: 4, kind: output, shape index: {}]  }
   0x1   :  { %v25_v0 = vld [vmem:[%s243_s1] sm:$0x3] }
   0x2   :  { %v26_v1 = vld [vmem:[%s244_s2] sm:$0x3] }
   0x3   :  { %v27_v2 = vld [vmem:[%s245_s3] sm:$0x3]  ;;  %v28_v3 = vsub.f32 %v25_v0, %v26_v1 }
   0x4   :  { %v29_v4 = vsub.f32 %v25_v0, %v27_v2 }
   0x5   :  { %10 = vsyncpa [#allocation4], 0  ;;  %v30_v5 = vmul.f32 %v28_v3, %v28_v3  ;;  %s178_s21 = smov 96   ;;  %s179_s22 = smov 32   ;;  %vm41_vm0 = vcmask 254976   ;;  %v35_v15 = vlaneseq  ;;  %v45_v16 = vstv %s242_s0 }
   0x6   :  { %v31_v6 = vmul.f32 %v29_v4, %v29_v4  ;;  %s180_s23 = smov 64   ;;  %vm49_vm2 = vcmask 1024   ;;  %vm23_vm3 = vcmask 0   ;;  %v181_v45 = vmov 0.0   ;;  %s182_s29 = smov [#allocation3]  }
   0x7   :  { %v36_v17 = vshrl.u32 %v35_v15, 7  ;;  %24 = vst.msk [vmem:[#allocation3] sm:$0x1] %vm23_vm3, %v181_v45  ;;  %s133_s30 = sshll.u32 %s182_s29, 4  ;;  %s134_s30 = int_to_ptr.vmem [resolvable:$true] %s133_s30 }
   0x8   :  { %v32_v7 = vsub.f32 %v30_v5, %v31_v6  ;;  %s154_s5 = scalar_lea.vmem %s134_s30, 16  ;;  %s158_s6 = scalar_lea.vmem %s134_s30, 32 }
   0x9   :  { %vm39_vm1 = vcmp.lt.s32.totalorder %v36_v17, 2  ;;  %p155_p0 = scmp.ne.s32.totalorder %s134_s30, %s154_s5  ;;  %p159_p1 = scmp.lt.s32.totalorder %s134_s30, %s134_s30 }
   0xa   :  { %62 = vrot.lane.b32.xlu0 %v32_v7, %s178_s21  ;;  %102 = vrot.lane.b32.xlu1 %v32_v7, %s179_s22  ;;  %v42_v8 = vsel %vm41_vm0, %v32_v7, 0.0  ;;  %p160_p2 = scmp.lt.s32.totalorder %s158_s6, %s154_s5 }
   0xc   :  { %p161_p3 = por %p160_p2, %p159_p1 }
   0xe   :  { %82 = vrot.lane.b32.xlu0 %v32_v7, %s180_s23  ;;  %v122_v3 = vld [vmem:[#allocation3] sm:$0x1]  ;;  %p162_p4 = pnand %p161_p3, %p155_p0 }
  0x2e   :  { %43 = vadd.xlane.f32.xlu1 %v42_v8 }
  0x7c   :  { %v63_v9 = vpop.permute.xlu0 %62  ;;  %v103_v10 = vpop.permute.xlu1 %102 }
  0x7d   :  { %v65_v11 = vsel %vm41_vm0, %v63_v9, 0.0  ;;  %v105_v12 = vsel %vm41_vm0, %v103_v10, 0.0 }
  0x7e   :  { %66 = vadd.xlane.f32.xlu0 %v65_v11  ;;  %106 = vadd.xlane.f32.xlu1 %v105_v12 }
  0x80   :  { %v83_v13 = vpop.permute.xlu0 %82 }
  0x81   :  { %v85_v14 = vsel %vm41_vm0, %v83_v13, 0.0 }
  0x82   :  { %86 = vadd.xlane.f32.xlu0 %v85_v14 }
  0xbb   :  { %v44_v18 = vpop.xlane.xlu1 %43 }
  0xbc   :  { %v46_v19 = vadd.f32 %v45_v16, %v44_v18 }
  0xbe   :  { %v47_v20 = vmax.f32 %v46_v19, 0.0 }
  0xc0   :  { %v48_v21 = vsel %vm39_vm1, %v47_v20, 0.0 }
  0xc1   :  { %v50_v22 = vsel %vm49_vm2, %v48_v21, 0.0 }
  0xc2   :  { %51 = vadd.xlane.f32.xlu0 %v50_v22 }
 0x10b   :  { %v67_v23 = vpop.xlane.xlu0 %66  ;;  %v107_v24 = vpop.xlane.xlu1 %106 }
 0x10c   :  { %v68_v25 = vadd.f32 %v67_v23, %v45_v16  ;;  %v108_v26 = vadd.f32 %v107_v24, %v45_v16 }
 0x10e   :  { %v69_v27 = vmax.f32 %v68_v25, 0.0  ;;  %v109_v28 = vmax.f32 %v108_v26, 0.0 }
 0x10f   :  { %v87_v29 = vpop.xlane.xlu0 %86 }
 0x110   :  { %v88_v30 = vadd.f32 %v87_v29, %v45_v16  ;;  %v70_v31 = vsel %vm39_vm1, %v69_v27, 0.0  ;;  %v110_v32 = vsel %vm39_vm1, %v109_v28, 0.0 }
 0x111   :  { %v71_v33 = vsel %vm49_vm2, %v70_v31, 0.0  ;;  %v111_v35 = vsel %vm49_vm2, %v110_v32, 0.0 }
 0x112   :  { %v89_v34 = vmax.f32 %v88_v30, 0.0  ;;  %72 = vadd.xlane.f32.xlu1 %v71_v33 }
 0x114   :  { %v90_v36 = vsel %vm39_vm1, %v89_v34, 0.0 }
 0x115   :  { %v91_v37 = vsel %vm49_vm2, %v90_v36, 0.0 }
 0x116   :  { %92 = vadd.xlane.f32.xlu0 %v91_v37  ;;  %112 = vadd.xlane.f32.xlu1 %v111_v35 }
 0x14f   :  { %v52_v38 = vpop.xlane.xlu0 %51 }
 0x150   :  { %v53_v39 = vrot.slane %v52_v38, 4 }
 0x152   :  { %v54_v40 = vadd.f32 %v53_v39, %v52_v38 }
 0x154   :  { %v55_v41 = vrot.slane %v54_v40, 2 }
 0x156   :  { %v56_v42 = vadd.f32 %v55_v41, %v54_v40 }
 0x158   :  { %v57_v43 = vrot.slane %v56_v42, 1 }
 0x15a   :  { %v58_v44 = vadd.f32 %v57_v43, %v56_v42 }
 0x15c   :  { %141 = vpush %v58_v44 }
 0x18d   :  { %s142_s0 = spop %141 }
 0x19f   :  { %v73_v46 = vpop.xlane.xlu1 %72 }
 0x1a0   :  { %v74_v47 = vrot.slane %v73_v46, 4 }
 0x1a2   :  { %v75_v48 = vadd.f32 %v74_v47, %v73_v46 }
 0x1a3   :  { %v93_v49 = vpop.xlane.xlu0 %92  ;;  %v113_v50 = vpop.xlane.xlu1 %112 }
 0x1a4   :  { %v76_v51 = vrot.slane %v75_v48, 2  ;;  %v94_v52 = vrot.slane %v93_v49, 4  ;;  %v114_v53 = vrot.slane %v113_v50, 4 }
 0x1a6   :  { %v95_v54 = vadd.f32 %v94_v52, %v93_v49  ;;  %v115_v55 = vadd.f32 %v114_v53, %v113_v50  ;;  %v77_v56 = vadd.f32 %v76_v51, %v75_v48 }
 0x1a8   :  { %v96_v57 = vrot.slane %v95_v54, 2  ;;  %v116_v58 = vrot.slane %v115_v55, 2  ;;  %v78_v59 = vrot.slane %v77_v56, 1 }
 0x1aa   :  { %v97_v60 = vadd.f32 %v96_v57, %v95_v54  ;;  %v117_v61 = vadd.f32 %v116_v58, %v115_v55  ;;  %v79_v62 = vadd.f32 %v78_v59, %v77_v56 }
 0x1ac   :  { %143 = vpush %v79_v62  ;;  %v98_v63 = vrot.slane %v97_v60, 1  ;;  %v118_v0 = vrot.slane %v117_v61, 1 }
 0x1ae   :  { %v99_v1 = vadd.f32 %v98_v63, %v97_v60  ;;  %v119_v2 = vadd.f32 %v118_v0, %v117_v61 }
 0x1b0   :  { %145 = vpush %v99_v1 }
 0x1b1   :  { %147 = vpush %v119_v2 }
 0x1dd   :  { %s144_s3 = spop %143 }
 0x1de   :  { %s81_s24 = sadd.f32 %s144_s3, %s142_s0 }
 0x1e1   :  { %s146_s25 = spop %145 }
 0x1e2   :  { %s101_s26 = sadd.f32 %s146_s25, %s81_s24  ;;  %s148_s27 = spop %147 }
 0x1e4   :  { %s121_s28 = sadd.f32 %s148_s27, %s101_s26 }
 0x1e6   :  { %v123_v4 = vstv %s121_s28 }
 0x1e7   :  { %v124_v5 = vadd.f32 %v123_v4, %v122_v3 }
 0x1e9   :  { %126 = vst.msk [vmem:[#allocation3] sm:$0x1] %vm23_vm3, %v124_v5 }
 0x1ea   :  { %165 = shalt.err (!%p162_p4)
}
 0x1eb   :  { %s166_s9 = scalar_lea.hbm %s246_s4, 16 }
 0x1ec   :  { %p167_p5 = scmp.ne.s32.totalorder %s246_s4, %s166_s9  ;;  %p170_p6 = scmp.lt.u32.totalorder %s166_s9, %s246_s4 }
 0x1ee   :  { %p172_p7 = pnand %p170_p6, %p167_p5 }
 0x1f0   :  { %175 = shalt.err (!%p172_p7)
}
 0x1f1   :  { %136 = dma.vmem_to_hbm [thread:$0]  %s134_s30, 16, %s246_s4, [#allocation4]  }
 0x1f2   :  { %176 = dma.done.wait [#allocation4], 16  }
 0x1f3   :  { %177 = vsyncadd [#allocation4], 4294967280 }
 0x1f4   :  { %140 = vsyncpa [#allocation4], 1 }

</bundles_post_ra>
